<compile_context>
chip_gen: v7x
topology: tpu7x:2x2x1
jax: 0.10.0
libtpu: 0.0.40
codegen_flags: <defaults>
</compile_context>

<pallas_src>
import math

import jax
import jax.numpy as jnp
from jax.experimental import pallas as pl
from jax.experimental.pallas import tpu as pltpu


def _cdiv(a, b):
    return -(-a // b)


def _vmem_capacity_bytes():
    try:
        return int(pltpu.get_tpu_info().vmem_capacity_bytes)
    except Exception:
        return 64 << 20  # conservative (v7x-sized) fallback -> safe on all gens


def _k_plan(k, in_itemsize):
    """Pick (kp, tk): tk a lane-aligned tile dividing kp, kp >= k minimal-ish.

    If K fits one tile, use a full-extent block (no alignment, no padding).
    Otherwise prefer 256-aligned tk (v6e/v7x MXU width) unless the 128-aligned
    plan saves >5% of padded-K work.
    """
    max_tk = 2048 if in_itemsize <= 2 else 1024
    if k <= max_tk:
        return k, k
    best_kp, best_tk = None, None
    for unit in (256, 128):
        lanes = _cdiv(k, unit)
        steps = _cdiv(lanes, max_tk // unit)
        tk = unit * _cdiv(lanes, steps)
        kp = tk * steps
        if best_kp is None or kp * 100 < best_kp * 95:
            best_kp, best_tk = kp, tk
    return best_kp, best_tk


def _select_mn_tiles(m, n, tk, in_itemsize, out_itemsize):
    """Lane-dense, MXU-aligned, VMEM-budgeted (tm, tn) + explicit vmem limit."""
    pack = max(8, 32 // in_itemsize)  # sublane packing: f32->8, bf16->16, int8->32
    vmem_cap = _vmem_capacity_bytes()
    budget = min(64 << 20, vmem_cap // 2)  # v7x (64 MiB VMEM) -> 32 MiB budget

    # M tile: full-extent when small, otherwise a pack-aligned balanced split.
    max_tm = 512
    if m <= max_tm:
        tm = m
    else:
        tm = pack * _cdiv(_cdiv(m, _cdiv(m, max_tm)), pack)

    # N tile: full-extent when it fits, otherwise a 256-aligned balanced split
    # (edge block, if any, is masked by Pallas -- no wrapper padding).
    max_tn = 2048
    if n <= max_tn:
        tn = n
    else:
        unit = 256
        lanes = _cdiv(n, unit)
        tn = unit * _cdiv(lanes, _cdiv(lanes, max_tn // unit))

    def footprint(tm_, tn_):
        # double-buffered x and W tiles + double-buffered (f32-or-wider) output tile
        return (2 * (tm_ * tk + tk * tn_) * in_itemsize
                + 2 * tm_ * tn_ * max(out_itemsize, 4))

    for _ in range(16):
        if footprint(tm, tn) <= budget:
            break
        if tn > 256:
            tn = 128 * max(2, _cdiv(tn, 128) // 2)
        elif tm > max(pack, 128):
            tm = pack * max(1, _cdiv(tm, pack) // 2)
        else:
            break

    # Guarantee >= 2 parallel output tiles so both v7x TensorCores get work.
    if _cdiv(m, tm) * _cdiv(n, tn) < 2:
        if n >= 256:
            tn = 128 * _cdiv(_cdiv(n, 128), 2)
        elif m >= 2 * pack:
            tm = pack * _cdiv(_cdiv(m, pack), 2)

    vmem_limit = int(min(vmem_cap * 3 // 4,
                         max(footprint(tm, tn) + tm * tn * 4 + (8 << 20), 32 << 20)))
    return tm, tn, vmem_limit


# ----------------------------- kernels ------------------------------------ #

def _single_k_kernel(x_ref, w_ref, o_ref):
    # Whole K in one tile: straight MXU matmul into the output block.
    o_ref[...] = jnp.dot(x_ref[...], w_ref[...],
                         preferred_element_type=jnp.float32).astype(o_ref.dtype)


def _acc_into_out_kernel(x_ref, w_ref, o_ref):
    # f32 output: accumulate directly into the resident output block (no scratch,
    # no final copy).  Output BlockSpec keeps the same block across the K axis.
    @pl.when(pl.program_id(2) == 0)
    def _():
        o_ref[...] = jnp.zeros_like(o_ref)

    o_ref[...] += jnp.dot(x_ref[...], w_ref[...], preferred_element_type=jnp.float32)


def _acc_scratch_kernel(x_ref, w_ref, o_ref, acc_ref):
    # Narrow output dtypes: accumulate in an f32 scratch, cast on the last K step.
    @pl.when(pl.program_id(2) == 0)
    def _():
        acc_ref[...] = jnp.zeros_like(acc_ref)

    acc_ref[...] += jnp.dot(x_ref[...], w_ref[...], preferred_element_type=jnp.float32)

    @pl.when(pl.program_id(2) == pl.num_programs(2) - 1)
    def _():
        o_ref[...] = acc_ref[...].astype(o_ref.dtype)


# ----------------------------- wrapper ------------------------------------ #

def _linear_no_bias_packed(x, w_kn, dim_in, dim_out, tk):
    """y = x @ W.T with W pre-packed as w_kn[(kp, dim_out)] = pad_K(W.T)."""
    orig_shape = x.shape
    assert orig_shape[-1] == dim_in
    m = int(math.prod(orig_shape[:-1])) if len(orig_shape) > 1 else 1
    x2d = x.reshape(m, dim_in)

    kp = w_kn.shape[0]
    in_isz = jnp.dtype(x.dtype).itemsize
    out_dtype = x.dtype
    out_isz = jnp.dtype(out_dtype).itemsize

    # Only per-call pad: K, and only when K > max_tk and not a tk multiple
    # (zero-padding K keeps the reduction exact). Typically a no-op.
    if kp != dim_in:
        x2d = jnp.pad(x2d, ((0, 0), (0, kp - dim_in)))

    tm, tn, vmem_limit = _select_mn_tiles(m, dim_out, tk, in_isz, out_isz)
    grid_m = _cdiv(m, tm)
    grid_n = _cdiv(dim_out, tn)
    n_k = kp // tk

    cost = pl.CostEstimate(
        flops=2 * m * dim_out * kp,
        transcendentals=0,
        # x is streamed grid_n times, W grid_m times; output written once.
        bytes_accessed=int(m * kp * in_isz * grid_n
                           + dim_out * kp * in_isz * grid_m
                           + m * dim_out * out_isz),
    )

    if n_k == 1:
        out = pl.pallas_call(
            _single_k_kernel,
            out_shape=jax.ShapeDtypeStruct((m, dim_out), out_dtype),
            grid_spec=pltpu.PrefetchScalarGridSpec(
                num_scalar_prefetch=0,
                grid=(grid_m, grid_n),
                in_specs=[
                    pl.BlockSpec((tm, tk), lambda i, j: (i, 0)),
                    pl.BlockSpec((tk, tn), lambda i, j: (0, j)),
                ],
                out_specs=pl.BlockSpec((tm, tn), lambda i, j: (i, j)),
            ),
            compiler_params=pltpu.CompilerParams(
                dimension_semantics=("parallel", "parallel"),
                vmem_limit_bytes=vmem_limit),
            cost_estimate=cost,
        )(x2d, w_kn)
    else:
        acc_in_out = jnp.dtype(out_dtype) == jnp.dtype(jnp.float32)
        kernel = _acc_into_out_kernel if acc_in_out else _acc_scratch_kernel
        scratch = [] if acc_in_out else [pltpu.VMEM((tm, tn), jnp.float32)]
        out = pl.pallas_call(
            kernel,
            out_shape=jax.ShapeDtypeStruct((m, dim_out), out_dtype),
            grid_spec=pltpu.PrefetchScalarGridSpec(
                num_scalar_prefetch=0,
                grid=(grid_m, grid_n, n_k),
                in_specs=[
                    pl.BlockSpec((tm, tk), lambda i, j, k: (i, k)),
                    pl.BlockSpec((tk, tn), lambda i, j, k: (k, j)),
                ],
                out_specs=pl.BlockSpec((tm, tn), lambda i, j, k: (i, j)),
                scratch_shapes=scratch,
            ),
            compiler_params=pltpu.CompilerParams(
                dimension_semantics=("parallel", "parallel", "arbitrary"),
                vmem_limit_bytes=vmem_limit),
            cost_estimate=cost,
        )(x2d, w_kn)

    return out.reshape(*orig_shape[:-1], dim_out)


class LinearNoBias:
    """Pallas-TPU equivalent of the PyTorch LinearNoBias module (y = x @ W.T).

    The nn.Linear-layout weight (dim_out, dim_in) is packed once at construction
    into K-major (kp, dim_out) layout (transpose + exact zero-pad of K when K
    must be tiled), so per-call work is exactly one Pallas matmul.
    """

    def __init__(self, weight):
        dim_out, dim_in = weight.shape
        self.dim_in, self.dim_out = dim_in, dim_out
        kp, tk = _k_plan(dim_in, jnp.dtype(weight.dtype).itemsize)
        self.tk = tk
        w = weight.T  # one-time, amortized (parameter setup)
        if kp != dim_in:
            w = jnp.pad(w, ((0, kp - dim_in), (0, 0)))
        self.w_kn = w

    def __call__(self, x):
        return _linear_no_bias_packed(x, self.w_kn, self.dim_in, self.dim_out, self.tk)


def linear_no_bias(x, weight):
    """One-shot convenience (packs the weight per call). Prefer LinearNoBias."""
    return LinearNoBias(weight)(x)


if __name__ == "__main__":
    key = jax.random.PRNGKey(0)

    # --- Test 1: module-sized shapes (batch=2, seq=8, dim_in=32, dim_out=64).
    dim_in, dim_out = 32, 64
    kx, kw, key = jax.random.split(key, 3)
    bound = 1.0 / math.sqrt(dim_in)  # nn.Linear default init: U(-1/sqrt(dim_in), +)
    weight = jax.random.uniform(kw, (dim_out, dim_in), dtype=jnp.float32,
                                minval=-bound, maxval=bound)
    x = jax.random.normal(kx, (2, 8, dim_in), dtype=jnp.float32)
    layer = LinearNoBias(weight)
    y = jax.block_until_ready(layer(x))
    y_ref = x @ weight.T
    assert y.shape == (2, 8, dim_out)
    assert jnp.allclose(y, y_ref, atol=1e-5, rtol=1e-5)

    # --- Test 2: ragged K/M/N. K=600 now runs as one full-extent K tile (zero
    # padding); ragged M handled by Pallas' masked edge block (no wrapper pad).
    dim_in2, dim_out2 = 600, 200
    kx2, kw2, key = jax.random.split(key, 3)
    w2 = jax.random.normal(kw2, (dim_out2, dim_in2), dtype=jnp.float32) * 0.02
    x2 = jax.random.normal(kx2, (2, 9, dim_in2), dtype=jnp.float32)
    y2 = jax.block_until_ready(LinearNoBias(w2)(x2))
    y2_ref = x2 @ w2.T
    assert y2.shape == (2, 9, dim_out2)
    assert jnp.allclose(y2, y2_ref, atol=1e-4, rtol=1e-4)

    # --- Test 3: K > max_tk -> multi-step-K accumulate-into-output path
    # (tk=768 divides K=2304 exactly, so still no K padding).
    dim_in3, dim_out3 = 2304, 384
    kx3, kw3 = jax.random.split(key)
    w3 = jax.random.normal(kw3, (dim_out3, dim_in3), dtype=jnp.float32) * 0.02
    x3 = jax.random.normal(kx3, (2, 16, dim_in3), dtype=jnp.float32)
    y3 = jax.block_until_ready(LinearNoBias(w3)(x3))
    y3_ref = x3 @ w3.T
    assert y3.shape == (2, 16, dim_out3)
    assert jnp.allclose(y3, y3_ref, atol=2e-3, rtol=2e-3)

    print("KERNEL_OK")
</pallas_src>

<mosaic_0001>
module attributes {stable_mosaic.version = 11 : i64} {
  func.func @_single_k_kernel(%arg0: i32, %arg1: i32, %arg2: memref<8x32xf32, #tpu.memory_space<vmem>>, %arg3: memref<32x64xf32, #tpu.memory_space<vmem>>, %arg4: memref<8x64xf32, #tpu.memory_space<vmem>>) attributes {dimension_semantics = [#tpu.dimension_semantics<parallel>, #tpu.dimension_semantics<parallel>], iteration_bounds = array<i64: 2, 1>, scalar_prefetch = 0 : i64, scratch_operands = 0 : i64, tpu.core_type = #tpu.core_type<tc>, window_params = [{transform_indices = @transform_0, window_bounds = array<i64: 8, 32>}, {transform_indices = @transform_1, window_bounds = array<i64: 32, 64>}, {transform_indices = @transform_2, window_bounds = array<i64: 8, 64>}]} {
    %c0 = arith.constant 0 : index
    %c0_0 = arith.constant 0 : index
    %0 = vector.load %arg2[%c0, %c0_0] : memref<8x32xf32, #tpu.memory_space<vmem>>, vector<8x32xf32>
    %c0_1 = arith.constant 0 : index
    %c0_2 = arith.constant 0 : index
    %1 = vector.load %arg3[%c0_1, %c0_2] : memref<32x64xf32, #tpu.memory_space<vmem>>, vector<32x64xf32>
    %cst = arith.constant dense<0.000000e+00> : vector<8x64xf32>
    %2 = tpu.matmul %0, %1, %cst {dimension_numbers = #tpu.dot_dimension_numbers<[1], [0], [0], [1], [0, 0, 1, 1], [], []>} : vector<8x32xf32>, vector<32x64xf32>, vector<8x64xf32> -> vector<8x64xf32>
    %c0_3 = arith.constant 0 : index
    %c0_4 = arith.constant 0 : index
    %3 = vector.load %arg4[%c0_3, %c0_4] : memref<8x64xf32, #tpu.memory_space<vmem>>, vector<8x64xf32>
    tpu.vector_store %arg4[%c0_3, %c0_4], %2 {strides = array<i32>} : memref<8x64xf32, #tpu.memory_space<vmem>>, vector<8x64xf32>,
    return
  }
  func.func @transform_0(%arg0: i32, %arg1: i32) -> (i32, i32) {
    %c0_i32 = arith.constant 0 : i32
    %c0_i32_0 = arith.constant 0 : i32
    return %arg0, %c0_i32 : i32, i32
  }
  func.func @transform_1(%arg0: i32, %arg1: i32) -> (i32, i32) {
    %c0_i32 = arith.constant 0 : i32
    %c0_i32_0 = arith.constant 0 : i32
    return %c0_i32, %arg1 : i32, i32
  }
  func.func @transform_2(%arg0: i32, %arg1: i32) -> (i32, i32) {
    %c0_i32 = arith.constant 0 : i32
    return %arg0, %arg1 : i32, i32
  }
}

</mosaic_0001>

<bundles_post_ra>
// kernel: tpu_custom_call.1
= control target key start
LH: loop header
LB: loop body
LE: loop exit
PB: predicated region body
PF: predicated region fallthrough
CT: control target
= control target key end

     0   :  { %7 = vsyncpa [#allocation3], 0  ;;  %s881_s0 = inlined_call_operand.hbm [shape: f32[16,32], index: 0, kind: input, shape index: {}]   ;;  %s882_s1 = inlined_call_operand.hbm [shape: f32[32,64], index: 1, kind: input, shape index: {}]   ;;  %s883_s2 = inlined_call_operand.hbm [shape: f32[16,64], index: 2, kind: output, shape index: {}]  }
   0x1   :  { %9 = vsyncpa [#allocation3 + $0x1], 0 }
   0x2   :  { %10 = vsyncpa [#allocation6], 0 }
   0x3   :  { %11 = vsyncpa [#allocation4], 0 }
   0x4   :  { %13 = vsyncpa [#allocation4 + $0x1], 0  ;;  %s667_s9 = smov 0   ;;  %s669_s10 = smov 0  }
   0x5   :  { %s671_s11 = smov 0   ;;  %s673_s12 = smov 0  }
   0x6   :  { %s675_s13 = smov 0   ;;  %s677_s14 = smov 0  }
   0x7 LB: > { %s382_s15 = sadd.s32 4294967295, %s642_s14   ;;  %s383_s16 = sadd.s32 4294967294, %s642_s14   ;;  %s642_s14 = sphi %s677_s14, %s19_s14   ;;  %s638_s13 = sphi %s675_s13, %s907_s13   ;;  %s634_s12 = sphi %s673_s12, %s906_s12   ;;  %s630_s11 = sphi %s671_s11, %s905_s11   ;;  %s626_s10 = sphi %s669_s10, %s904_s10   ;;  %s622_s9 = sphi %s667_s9, %s903_s9  }
   0x8   : > { %p51_p0 = scmp.ne.s32.totalorder %s626_s10, %s622_s9  ;;  %p701_p1 = scmp.eq.s32.totalorder %s382_s15, 0 }
   0x9   : > { %p705_p2 = scmp.eq.s32.totalorder %s382_s15, 1  ;;  %p109_p3 = scmp.eq.s32.totalorder %s383_s16, 1 }
   0xa   : > { %s888_s17 = scalar_select %p701_p1, 1, 0 }
   0xb   : > { %s889_s18 = scalar_select %p705_p2, 1, 0 }
   0xc   : > { %p711_p4 = por %p701_p1, %p51_p0  ;;  %p384_p5 = scmp.ge.s32.totalorder %s642_s14, 1 }
   0xd   : > { %p716_p6 = por %p109_p3, %p51_p0  ;;  %p116_p7 = scmp.lt.s32.totalorder %s642_s14, 3 }
   0xe   : > { %s890_s19 = scalar_select %p711_p4, 1, 0 }
   0xf   : > { %s891_s20 = scalar_select %p716_p6, 1, 0 }
  0x10   : > { %p721_p8 = pnand %p384_p5, %p116_p7  ;;  %s644_s22 = smov [#allocation5]  }
  0x11   : > { %s130_s23 = sshll.u32 %s644_s22, 4  ;;  %s31_s25 = sadd.s32 1, %s638_s13  ;;  %s131_s23 = int_to_ptr.vmem [resolvable:$true] %s130_s23 }
  0x12   : > { %s892_s21 = scalar_select %p721_p8, 1, 0 }
  0x13   : > { %p428_p9 = pneg %p721_p8  ;;  %s498_s28 = scalar_lea.hbm %s882_s1, 512 }
  0x14   : > { %p499_p12 = scmp.ne.s32.totalorder %s882_s1, %s498_s28  ;;  %p505_p5 = scmp.lt.u32.totalorder %s498_s28, %s882_s1 }
  0x15   : > { %p730_p11 = pnand %p428_p9, %p701_p1 }
  0x17   : > { %p500_p13 = pneg %p730_p11 }
  0x19   : > { %p501_p0 = pnand %p500_p13, %p499_p12 }
  0x1b   : > { %p502_p3 = pneg %p501_p0 }
  0x1d   : > { %p507_p7 = pnand %p505_p5, %p502_p3 }
  0x1f   : > { %510 = shalt.err (!%p507_p7)
}
  0x20   : > { %s511_s5 = scalar_lea.vmem %s131_s23, 512  ;;  %p519_p1 = scmp.lt.s32.totalorder %s131_s23, %s131_s23 }
  0x21   : > { %p512_p9 = scmp.ne.s32.totalorder %s131_s23, %s511_s5  ;;  %p520_p4 = scmp.lt.s32.totalorder %s511_s5, %s511_s5 }
  0x23   : > { %p514_p10 = pnand %p512_p9, %p500_p13  ;;  %p521_p8 = por %p520_p4, %p519_p1 }
  0x25   : > { %p515_p6 = pneg %p514_p10 }
  0x27   : > { %p522_p2 = pnand %p521_p8, %p515_p6 }
  0x29   : > { %525 = shalt.err (!%p522_p2)
}
  0x2a   : > { %s645_s6 = smov 128   ;;  %s646_s7 = smov 8  }
  0x2b   : > { %431 = dma.hbm_to_vmem [thread:$0]  (!%p730_p11), %s882_s1, 512, %s131_s23, [#allocation6], %s645_s6, %s645_s6, %s646_s7  }
  0x2c   : > { %p33_p1 = scmp.ge.s32.totalorder %s31_s25, 2  ;;  %s38_s16 = sadd.s32 1, %s630_s11 }
  0x2d   : > { %p45_p2 = scmp.ne.s32.totalorder %s630_s11, %s626_s10  ;;  %p46_p4 = scmp.eq.s32.totalorder %s642_s14, 0 }
  0x2e   : > { %s909_s25 = smov (%p33_p1, %s31_s25), 0  ;;  %p895_p8 = scmp.ne.s32.totalorder %s889_s18, 0 }
  0x2f   : > { %p757_p6 = por %p46_p4, %p45_p2  ;;  %s35_s24 = ssub.s32 %s638_s13, %s909_s25 }
  0x30   : > { %p763_p10 = por %p895_p8, %p45_p2  ;;  %p441_p12 = scmp.lt.s32.totalorder %s642_s14, 2 }
  0x31   : > { %p36_p11 = scmp.eq.s32.totalorder %s35_s24, 0  ;;  %s144_s23 = sand.u32 1, %s630_s11  }
  0x32   : > { %s387_s27 = sshll.u32 %s144_s23, 3  ;;  %s388_s29 = sshll.u32 %s638_s13, 7 }
  0x33   : > { %s772_s28 = scalar_select %p36_p11, %s630_s11, %s38_s16  }
  0x34   : > { %s778_s4 = scalar_lea.hbm %s881_s0, %s388_s29  ;;  %s148_s18 = scalar_lea.vmem [#allocation2], %s387_s27 }
  0x35   : > { %s155_s5 = sshll.u32 %s148_s18, 4  ;;  %p784_p13 = pnand %p441_p12, %p757_p6  ;;  %s780_s5 = int_to_ptr.vmem [resolvable:$true] %s155_s5 }
  0x36   : > { %s145_s7 = scalar_lea.sflag [#allocation3], %s144_s23  ;;  %s526_s8 = scalar_lea.hbm %s778_s4, 128 }
  0x37   : > { %p527_p0 = scmp.ne.s32.totalorder %s778_s4, %s526_s8  ;;  %p528_p3 = pneg %p784_p13 }
  0x38   : > { %s531_s24 = scalar_lea.hbm %s881_s0, 256  ;;  %p532_p9 = scmp.lt.u32.totalorder %s778_s4, %s881_s0 }
  0x39   : > { %p529_p5 = pnand %p528_p3, %p527_p0  ;;  %p533_p1 = scmp.lt.u32.totalorder %s531_s24, %s526_s8 }
  0x3a   : > { %p535_p4 = scmp.lt.u32.totalorder %s526_s8, %s778_s4 }
  0x3b   : > { %p530_p7 = pneg %p529_p5  ;;  %p534_p2 = por %p533_p1, %p532_p9 }
  0x3d   : > { %p536_p6 = por %p535_p4, %p534_p2 }
  0x3f   : > { %p537_p8 = pnand %p536_p6, %p530_p7 }
  0x41   : > { %540 = shalt.err (!%p537_p8)
}
  0x42   : > { %s541_s23 = scalar_lea.vmem %s780_s5, 128  ;;  %s647_s29 = smov [#allocation2]  }
  0x43   : > { %p542_p12 = scmp.ne.s32.totalorder %s780_s5, %s541_s23  ;;  %s546_s30 = sshll.u32 %s647_s29, 4  ;;  %s547_s30 = int_to_ptr.vmem [resolvable:$false] %s546_s30 }
  0x44   : > { %s548_s3 = scalar_lea.vmem %s547_s30, 256  ;;  %p549_p5 = scmp.lt.s32.totalorder %s780_s5, %s547_s30 }
  0x45   : > { %p544_p11 = pnand %p542_p12, %p528_p3  ;;  %p550_p9 = scmp.lt.s32.totalorder %s548_s3, %s541_s23 }
  0x47   : > { %p545_p0 = pneg %p544_p11  ;;  %p551_p1 = por %p550_p9, %p549_p5 }
  0x49   : > { %p552_p2 = pnand %p551_p1, %p545_p0 }
  0x4b   : > { %555 = shalt.err (!%p552_p2)
}
  0x4c   : > { %435 = dma.hbm_to_vmem [thread:$0]  (!%p784_p13), %s778_s4, 128, %s780_s5, %s145_s7  }
  0x4d   : > { %p898_p7 = scmp.ne.s32.totalorder %s892_s21, 0 }
  0x4e   : > { %s816_s18 = sand.u32 (!%p898_p7), 1, %s626_s10   ;;  %p899_p3 = scmp.ne.s32.totalorder (!%p898_p7), %s890_s19, 0 }
  0x4f   : > { %164 = sbr.rel (%p898_p7) target bundleno = 327 (0x147), region = 28  ;;  %s390_s8 = sshll.u32 (!%p898_p7), %s816_s18, 3 }
  0x50   : > { %s167_s15 = scalar_lea.sflag (!%p898_p7), [#allocation3], %s816_s18  ;;  %s170_s16 = scalar_lea.vmem (!%p898_p7), [#allocation2], %s390_s8 }
  0x56   : > { %609 = dma.done.wait (%p899_p3), %s167_s15, 128  }
  0x57   : > { %611 = vsyncadd (%p899_p3), %s167_s15, 4294967168  ;;  %p900_p4 = scmp.ne.s32.totalorder %s888_s17, 0 }
  0x59   : > { %613 = dma.done.wait (%p900_p4), [#allocation6], 512  }
  0x5a   : > { %615 = vsyncadd (%p900_p4), [#allocation6], 4294966784  ;;  %v648_v0 = vmov 0.0|0.0   ;;  %vm649_vm0 = vmmov 0   ;;  %v650_v1 = vmov 0.0   ;;  %v196_v2 = vld [vmem:[#allocation5] sm:$0xff] }
  0x5b   : > { %414 = vmatprep.subr.bf16.mxu0 %v648_v0  ;;  %411 = vmatprep.mubr.msk.f32.mxu0 %vm649_vm0, %v650_v1  ;;  %v197_v3 = vld [vmem:[#allocation5 + $0x8] sm:$0xff]  ;;  %v198_v4 = vld [vmem:[#allocation5 + $0x10] sm:$0xff]  ;;  %v199_v6 = vld [vmem:[#allocation5 + $0x18] sm:$0xff]  ;;  %vm200_vm1 = vcmask 261120   ;;  %s395_s17 = sshll.u32 %s634_s12, 7  ;;  %s194_s19 = scalar_lea.vmem [#allocation7], %s390_s8 }
  0x5c   : > { %v415_v5 = vpack.c.bf16 %v197_v3, %v196_v2  ;;  %v418_v7 = vpack.c.bf16 %v199_v6, %v198_v4  ;;  %v195_v8 = vld [vmem:[%s170_s16] sm:$0xff]  ;;  %s291_s21 = sshll.u32 %s194_s19, 4  ;;  %vm274_vm2 = vcmask 523264   ;;  %s832_s6 = scalar_lea.hbm %s883_s2, %s395_s17  ;;  %s834_s21 = int_to_ptr.vmem [resolvable:$true] %s291_s21 }
  0x5d   : > { %s277_s7 = scalar_lea.sflag [#allocation4], %s816_s18  ;;  %s556_s24 = scalar_lea.vmem %s834_s21, 128 }
  0x5e   : > { %416 = vmatpush3.bf16.msra.mxu0 %v415_v5  ;;  %p557_p13 = scmp.ne.s32.totalorder %s834_s21, %s556_s24  ;;  %s651_s12 = smov [#allocation7]  }
  0x5f   : > { %417 = vmatprep.subr.bf16.mxu0 %v648_v0  ;;  %s560_s22 = sshll.u32 %s651_s12, 4  ;;  %s561_s22 = int_to_ptr.vmem [resolvable:$false] %s560_s22 }
  0x60   : > { %p558_p6 = pnand %p557_p13, %p763_p10  ;;  %s562_s27 = scalar_lea.vmem %s561_s22, 256 }
  0x61   : > { %p563_p12 = scmp.lt.s32.totalorder %s834_s21, %s561_s22  ;;  %p564_p11 = scmp.lt.s32.totalorder %s562_s27, %s556_s24 }
  0x62   : > { %419 = vmatpush3.bf16.msra.mxu0 %v418_v7  ;;  %p559_p8 = pneg %p558_p6 }
  0x63   : > { %p565_p0 = por %p564_p11, %p563_p12 }
  0x65   : > { %412 = vmatmul.mubr.msk.f32.vlgmr.msra.gmra.mrb[0].mxu0 %vm200_vm1, %v195_v8  ;;  %p566_p5 = pnand %p565_p0, %p559_p8 }
 0x138   : > { %v270_v9 = vpop.f32.mrb[0].mxu0 }
 0x139   : > { %275 = vst.msk [vmem:[%s194_s19] sm:$0xff] %vm274_vm2, %v270_v9  ;;  %v413_v10 = vpop.f32.mrb[1].mxu0 }
 0x13a   : > { %569 = shalt.err (!%p566_p5)
}
 0x13b   : > { %s570_s23 = scalar_lea.hbm %s832_s6, 128  ;;  %s574_s3 = scalar_lea.hbm %s883_s2, 256 }
 0x13c   : > { %p571_p9 = scmp.ne.s32.totalorder %s832_s6, %s570_s23  ;;  %p575_p7 = scmp.lt.u32.totalorder %s832_s6, %s883_s2 }
 0x13d   : > { %p576_p3 = scmp.lt.u32.totalorder %s574_s3, %s570_s23  ;;  %p578_p13 = scmp.lt.u32.totalorder %s570_s23, %s832_s6 }
 0x13e   : > { %p572_p1 = pnand %p571_p9, %p763_p10 }
 0x13f   : > { %p577_p4 = por %p576_p3, %p575_p7 }
 0x140   : > { %p573_p2 = pneg %p572_p1 }
 0x141   : > { %p579_p6 = por %p578_p13, %p577_p4 }
 0x143   : > { %p580_p8 = pnand %p579_p6, %p573_p2 }
 0x145   : > { %583 = shalt.err (!%p580_p8)
}
 0x146   : > { %426 = dma.vmem_to_hbm [thread:$0]  (%p763_p10), %s834_s21, 128, %s832_s6, %s277_s7  }
 0x147 PF: > { %s303_s15 = sand.u32 1, %s622_s9   ;;  %p901_p12 = scmp.ne.s32.totalorder %s891_s20, 0 }
 0x148   : > { %p902_p11 = scmp.ge.s32.totalorder %s642_s14, 2  ;;  %s304_s16 = scalar_lea.sflag [#allocation4], %s303_s15 }
 0x14a   : > { %p437_p0 = pnand %p902_p11, %p901_p12 }
 0x14c   : > { %617 = dma.done.wait (!%p437_p0), %s304_s16, 128  }
 0x14d   : > { %619 = vsyncadd (!%p437_p0), %s304_s16, 4294967168  ;;  %s19_s14 = sadd.s32 1, %s642_s14   ;;  %s903_s9 = smov %s626_s10 }
 0x14e   : > { %p16_p5 = scmp.ge.s32.totalorder %s19_s14, 4   ;;  %s904_s10 = smov %s630_s11 }
 0x14f   : > { %s905_s11 = smov %s772_s28  ;;  %s906_s12 = smov %s638_s13 }
 0x150   : > { %s907_s13 = smov %s909_s25  ;;  %18 = sbr.rel (!%p16_p5) target bundleno = 7 (0x7), region = 78 }
 0x157   :  { %309 = vsyncpa [#allocation3], 1 }
 0x158   :  { %311 = vsyncpa [#allocation3 + $0x1], 1 }
 0x159   :  { %312 = vsyncpa [#allocation6], 1 }
 0x15a   :  { %313 = vsyncpa [#allocation4], 1 }
 0x15b   :  { %315 = vsyncpa [#allocation4 + $0x1], 1 }

</bundles_post_ra>
